<compile_context>
chip_gen: v5e
topology: v5e:2x2
jax: 0.10.0
libtpu: 0.0.40
codegen_flags: <defaults>
</compile_context>

<pallas_src>
import jax
import jax.numpy as jnp
from jax.experimental import pallas as pl
from jax.experimental.pallas import tpu as pltpu

# ---- sizes (small, consistent with the module) ------------------------------
B = 2          # batch
N = 8          # number of reference examples per query
D = 32         # input_size
H = 32         # hidden_size
R = B * N + B  # stacked rows: reference rows first, then query rows
EPS = 1e-5     # torch.nn.LayerNorm default eps
CLAMP = 1e-4   # base.clamp(0.0001, 1 - 0.0001)


# ----------------------------------------------------------------------------
# fused ResidualHead kernel (single invocation, whole batch, single MXU push)
# ----------------------------------------------------------------------------
def residual_head_kernel(x_ref, vals_ref, w_ref, aff_ref, sc_ref, o_ref):
    x = x_ref[...]            # (R, D): rows [0:B*N] = refs, rows [B*N:R] = queries
    vals = vals_ref[...]      # (B, N)
    inv_tau_h = sc_ref[0]     # 1 / (tau * sqrt(H))
    scale = sc_ref[1]
    res_scale = sc_ref[2]

    # --- shared affine-free pre-LayerNorm (affine folded into W) ------------
    # independent sum / sum-of-squares reductions overlap in the XLU
    s1 = jnp.sum(x, axis=-1, keepdims=True)
    s2 = jnp.sum(x * x, axis=-1, keepdims=True)
    mean = s1 * (1.0 / D)
    var = s2 * (1.0 / D) - mean * mean
    xn = (x - mean) * jax.lax.rsqrt(var + EPS)                         # (R, D)

    # --- single MXU matmul for both branches: (R, D) @ (D, 2H) --------------
    y = jnp.dot(xn, w_ref[...], preferred_element_type=jnp.float32)    # (R, 2H)

    # reference rows take lanes [0:H], query rows take lanes [H:2H]
    row = jax.lax.broadcasted_iota(jnp.int32, (R, H), 0)
    y_sel = jnp.where(row < B * N, y[:, :H], y[:, H:])                 # (R, H)

    # --- fused linear-bias + post-LayerNorm with per-row affine slabs -------
    z = y_sel + aff_ref[0]                                             # + bias
    t1 = jnp.sum(z, axis=-1, keepdims=True)
    t2 = jnp.sum(z * z, axis=-1, keepdims=True)
    zm = t1 * (1.0 / H)
    zv = t2 * (1.0 / H) - zm * zm
    proj = (z - zm) * jax.lax.rsqrt(zv + EPS) * aff_ref[1] + aff_ref[2]

    rp = proj[0:B * N, :].reshape(B, N, H)
    qp = proj[B * N:R, :].reshape(B, 1, H)

    # scores[b, n] = <r_proj[b, n], q_proj[b]> / (sqrt(H) * tau)  (scales folded)
    scores = jnp.sum(rp * qp, axis=-1) * inv_tau_h                     # (B, N)

    # TODO(synk): top_k filtering branch (torch.topk + scatter_) not
    # implemented — module default is top_k=None.

    # softmax with max-subtraction, as in the reference.
    w = scores - jnp.max(scores, axis=-1, keepdims=True)
    e = jnp.exp(w)
    p = e * pl.reciprocal(jnp.sum(e, axis=-1, keepdims=True), approx=False)
    base = jnp.sum(p * vals, axis=-1, keepdims=True)                   # (B, 1)

    # Platt scaling: sigmoid(scale * logit(clamp(base)) + res_scale).
    # TODO(synk): 'temperature' / 'group_logit_temp' / 'plain' scaling branches
    # not implemented — module default is scaling='platt'.
    base = jnp.clip(base, CLAMP, 1.0 - CLAMP)
    logit = jnp.log(base / (1.0 - base))
    o_ref[...] = jax.nn.sigmoid(scale * logit + res_scale)


def residual_head_forward(packed, q, r, ref_vals, tau):
    """q: (B, D), r: (B, N, D), ref_vals: (B, N), tau: scalar -> (B,)"""
    # fold batch & refs onto the sublane axis: refs first, queries last
    x = jnp.concatenate([r.reshape(B * N, D), q], axis=0).astype(jnp.float32)
    inv_tau_h = 1.0 / (jnp.asarray(tau, jnp.float32) * (H ** 0.5))
    scalars = jnp.stack([inv_tau_h,
                         jnp.asarray(packed["scale"], jnp.float32),
                         jnp.asarray(packed["res_scale"], jnp.float32)])
    vmem = pl.BlockSpec(memory_space=pltpu.MemorySpace.VMEM)
    smem = pl.BlockSpec(memory_space=pltpu.MemorySpace.SMEM)
    out = pl.pallas_call(
        residual_head_kernel,
        out_shape=jax.ShapeDtypeStruct((B, 1), jnp.float32),
        in_specs=[vmem, vmem, vmem, vmem, smem],
        out_specs=vmem,
    )(x, ref_vals.astype(jnp.float32), packed["w"], packed["aff"], scalars)
    return out[:, 0]


# ----------------------------------------------------------------------------
# one-time parameter packing (folds pre-LN affine into the Linear and builds
# the fused weight / per-row affine slabs consumed by the kernel)
# ----------------------------------------------------------------------------
def pack_params(params):
    def fold_w(ln0, w):
        return ln0[0][:, None] * w                       # diag(gamma0) @ w

    def fold_b(ln0, w, post):
        return post[0] + ln0[1] @ w                      # b + beta0 @ w

    # weight slab: reference half on lanes [0:H], query half on lanes [H:2H]
    w_slab = jnp.concatenate(
        [fold_w(params["r_ln0"], params["r_w"]),
         fold_w(params["q_ln0"], params["q_w"])], axis=1).astype(jnp.float32)

    r_bias = fold_b(params["r_ln0"], params["r_w"], params["r_post"])
    q_bias = fold_b(params["q_ln0"], params["q_w"], params["q_post"])

    def rowify(r_vec, q_vec):                            # (R, H), refs then queries
        return jnp.concatenate([jnp.tile(r_vec[None, :], (B * N, 1)),
                                jnp.tile(q_vec[None, :], (B, 1))], axis=0)

    aff = jnp.stack([rowify(r_bias, q_bias),
                     rowify(params["r_post"][1], params["q_post"][1]),
                     rowify(params["r_post"][2], params["q_post"][2])],
                    axis=0).astype(jnp.float32)          # (3, R, H)

    return {"w": w_slab, "aff": aff,
            "scale": params["scale"], "res_scale": params["res_scale"]}


# ----------------------------------------------------------------------------
# deterministic parameter init (PyTorch-like scales)
# ----------------------------------------------------------------------------
def init_params(key):
    kq, kr = jax.random.split(key, 2)
    bound = 1.0 / (D ** 0.5)   # nn.Linear default init range

    def branch(bkey):
        kw, kb, kg0, kb0, kg1, kb1 = jax.random.split(bkey, 6)
        ln0 = jnp.stack([1.0 + 0.1 * jax.random.normal(kg0, (D,)),
                         0.05 * jax.random.normal(kb0, (D,))]).astype(jnp.float32)
        w = jax.random.uniform(kw, (D, H), jnp.float32, -bound, bound)
        post = jnp.stack([jax.random.uniform(kb, (H,), jnp.float32, -bound, bound),
                          1.0 + 0.1 * jax.random.normal(kg1, (H,)),
                          0.05 * jax.random.normal(kb1, (H,))]).astype(jnp.float32)
        return ln0, w, post

    q_ln0, q_w, q_post = branch(kq)
    r_ln0, r_w, r_post = branch(kr)
    return {
        "q_ln0": q_ln0, "q_w": q_w, "q_post": q_post,
        "r_ln0": r_ln0, "r_w": r_w, "r_post": r_post,
        "scale": jnp.asarray(1.0, jnp.float32),      # nn.Parameter(torch.ones(1))
        "res_scale": jnp.asarray(1.0, jnp.float32),  # nn.Parameter(torch.ones(1))
    }


# ----------------------------------------------------------------------------
# pure-JAX reference (mirrors the PyTorch forward, original parameterization)
# ----------------------------------------------------------------------------
def ref_forward(params, q, r, ref_vals, tau):
    def ln(x, g, b):
        m = jnp.mean(x, axis=-1, keepdims=True)
        v = jnp.mean((x - m) ** 2, axis=-1, keepdims=True)
        return (x - m) / jnp.sqrt(v + EPS) * g + b

    def proj(x, ln0, w, post):
        x = ln(x, ln0[0], ln0[1])
        x = x @ w + post[0]
        return ln(x, post[1], post[2])

    qp = proj(q, params["q_ln0"], params["q_w"], params["q_post"])   # (B, H)
    rp = proj(r, params["r_ln0"], params["r_w"], params["r_post"])   # (B, N, H)
    scores = jnp.einsum("bnh,bh->bn", rp, qp) / (H ** 0.5)
    w = scores / tau
    w = w - jnp.max(w, axis=-1, keepdims=True)
    w = jax.nn.softmax(w, axis=-1)
    base = jnp.sum(w * ref_vals, axis=-1)
    base = jnp.clip(base, CLAMP, 1.0 - CLAMP)
    return jax.nn.sigmoid(params["scale"] * jnp.log(base / (1.0 - base))
                          + params["res_scale"])


if __name__ == "__main__":
    key = jax.random.PRNGKey(0)
    pkey, qkey, rkey, vkey = jax.random.split(key, 4)
    params = init_params(pkey)
    packed = pack_params(params)

    q = jax.random.normal(qkey, (B, D), jnp.float32)
    r = jax.random.normal(rkey, (B, N, D), jnp.float32)
    ref_vals = jax.random.uniform(vkey, (B, N), jnp.float32, 0.05, 0.95)
    tau = 0.7

    out = residual_head_forward(packed, q, r, ref_vals, tau)
    out = jax.block_until_ready(out)

    assert out.shape == (B,), out.shape
    assert bool(jnp.all(jnp.isfinite(out)))
    assert bool(jnp.all((out >= 0.0) & (out <= 1.0)))

    expected = ref_forward(params, q, r, ref_vals, tau)
    assert bool(jnp.allclose(out, expected, atol=5e-3)), (out, expected)
    print("KERNEL_OK")
</pallas_src>

<mosaic_0001>
module attributes {stable_mosaic.version = 11 : i64} {
  func.func @residual_head_kernel(%arg0: memref<18x32xf32, #tpu.memory_space<vmem>>, %arg1: memref<2x8xf32, #tpu.memory_space<vmem>>, %arg2: memref<32x64xf32, #tpu.memory_space<vmem>>, %arg3: memref<3x18x32xf32, #tpu.memory_space<vmem>>, %arg4: memref<3xf32, #tpu.memory_space<smem>>, %arg5: memref<2x1xf32, #tpu.memory_space<vmem>>) attributes {dimension_semantics = [], scalar_prefetch = 0 : i64, scratch_operands = 0 : i64, tpu.core_type = #tpu.core_type<tc>} {
    %c0 = arith.constant 0 : index
    %c0_0 = arith.constant 0 : index
    %0 = vector.load %arg0[%c0, %c0_0] : memref<18x32xf32, #tpu.memory_space<vmem>>, vector<18x32xf32>
    %c0_1 = arith.constant 0 : index
    %c0_2 = arith.constant 0 : index
    %1 = vector.load %arg1[%c0_1, %c0_2] : memref<2x8xf32, #tpu.memory_space<vmem>>, vector<2x8xf32>
    %c0_3 = arith.constant 0 : index
    %2 = memref.load %arg4[%c0_3] : memref<3xf32, #tpu.memory_space<smem>>
    %c1 = arith.constant 1 : index
    %3 = memref.load %arg4[%c1] : memref<3xf32, #tpu.memory_space<smem>>
    %c2 = arith.constant 2 : index
    %4 = memref.load %arg4[%c2] : memref<3xf32, #tpu.memory_space<smem>>
    %cst = arith.constant dense<0.000000e+00> : vector<18xf32>
    %5 = vector.multi_reduction <add>, %0, %cst [1] : vector<18x32xf32> to vector<18xf32>
    %6 = vector.shape_cast %5 : vector<18xf32> to vector<18x1xf32>
    %7 = arith.mulf %0, %0 : vector<18x32xf32>
    %cst_4 = arith.constant dense<0.000000e+00> : vector<18xf32>
    %8 = vector.multi_reduction <add>, %7, %cst_4 [1] : vector<18x32xf32> to vector<18xf32>
    %9 = vector.shape_cast %8 : vector<18xf32> to vector<18x1xf32>
    %cst_5 = arith.constant 3.125000e-02 : f32
    %10 = vector.broadcast %cst_5 : f32 to vector<18x1xf32>
    %11 = arith.mulf %6, %10 : vector<18x1xf32>
    %cst_6 = arith.constant 3.125000e-02 : f32
    %12 = vector.broadcast %cst_6 : f32 to vector<18x1xf32>
    %13 = arith.mulf %9, %12 : vector<18x1xf32>
    %14 = arith.mulf %11, %11 : vector<18x1xf32>
    %15 = arith.subf %13, %14 : vector<18x1xf32>
    %16 = vector.broadcast %11 : vector<18x1xf32> to vector<18x32xf32>
    %17 = arith.subf %0, %16 : vector<18x32xf32>
    %cst_7 = arith.constant 9.99999974E-6 : f32
    %18 = vector.broadcast %cst_7 : f32 to vector<18x1xf32>
    %19 = arith.addf %15, %18 : vector<18x1xf32>
    %20 = math.rsqrt %19 : vector<18x1xf32>
    %21 = vector.broadcast %20 : vector<18x1xf32> to vector<18x32xf32>
    %22 = arith.mulf %17, %21 : vector<18x32xf32>
    %c0_8 = arith.constant 0 : index
    %c0_9 = arith.constant 0 : index
    %23 = vector.load %arg2[%c0_8, %c0_9] : memref<32x64xf32, #tpu.memory_space<vmem>>, vector<32x64xf32>
    %cst_10 = arith.constant dense<0.000000e+00> : vector<18x64xf32>
    %24 = tpu.matmul %22, %23, %cst_10 {dimension_numbers = #tpu.dot_dimension_numbers<[1], [0], [0], [1], [0, 0, 1, 1], [], []>} : vector<18x32xf32>, vector<32x64xf32>, vector<18x64xf32> -> vector<18x64xf32>
    %25 = tpu.iota {dimensions = array<i32: 0>} : vector<18x32xi32>
    %c16_i32 = arith.constant 16 : i32
    %26 = vector.broadcast %c16_i32 : i32 to vector<18x32xi32>
    %27 = arith.cmpi slt, %25, %26 : vector<18x32xi32>
    %28 = vector.extract_strided_slice %24 {offsets = [0, 0], sizes = [18, 32], strides = [1, 1]} : vector<18x64xf32> to vector<18x32xf32>
    %29 = vector.extract_strided_slice %24 {offsets = [0, 32], sizes = [18, 32], strides = [1, 1]} : vector<18x64xf32> to vector<18x32xf32>
    %30 = arith.select %27, %28, %29 : vector<18x32xi1>, vector<18x32xf32>
    %c0_11 = arith.constant 0 : index
    %c0_12 = arith.constant 0 : index
    %c0_13 = arith.constant 0 : index
    %31 = vector.load %arg3[%c0_11, %c0_12, %c0_13] : memref<3x18x32xf32, #tpu.memory_space<vmem>>, vector<1x18x32xf32>
    %32 = vector.shape_cast %31 : vector<1x18x32xf32> to vector<18x32xf32>
    %33 = arith.addf %30, %32 : vector<18x32xf32>
    %cst_14 = arith.constant dense<0.000000e+00> : vector<18xf32>
    %34 = vector.multi_reduction <add>, %33, %cst_14 [1] : vector<18x32xf32> to vector<18xf32>
    %35 = vector.shape_cast %34 : vector<18xf32> to vector<18x1xf32>
    %36 = arith.mulf %33, %33 : vector<18x32xf32>
    %cst_15 = arith.constant dense<0.000000e+00> : vector<18xf32>
    %37 = vector.multi_reduction <add>, %36, %cst_15 [1] : vector<18x32xf32> to vector<18xf32>
    %38 = vector.shape_cast %37 : vector<18xf32> to vector<18x1xf32>
    %cst_16 = arith.constant 3.125000e-02 : f32
    %39 = vector.broadcast %cst_16 : f32 to vector<18x1xf32>
    %40 = arith.mulf %35, %39 : vector<18x1xf32>
    %cst_17 = arith.constant 3.125000e-02 : f32
    %41 = vector.broadcast %cst_17 : f32 to vector<18x1xf32>
    %42 = arith.mulf %38, %41 : vector<18x1xf32>
    %43 = arith.mulf %40, %40 : vector<18x1xf32>
    %44 = arith.subf %42, %43 : vector<18x1xf32>
    %45 = vector.broadcast %40 : vector<18x1xf32> to vector<18x32xf32>
    %46 = arith.subf %33, %45 : vector<18x32xf32>
    %cst_18 = arith.constant 9.99999974E-6 : f32
    %47 = vector.broadcast %cst_18 : f32 to vector<18x1xf32>
    %48 = arith.addf %44, %47 : vector<18x1xf32>
    %49 = math.rsqrt %48 : vector<18x1xf32>
    %50 = vector.broadcast %49 : vector<18x1xf32> to vector<18x32xf32>
    %51 = arith.mulf %46, %50 : vector<18x32xf32>
    %c1_19 = arith.constant 1 : index
    %c0_20 = arith.constant 0 : index
    %c0_21 = arith.constant 0 : index
    %52 = vector.load %arg3[%c1_19, %c0_20, %c0_21] : memref<3x18x32xf32, #tpu.memory_space<vmem>>, vector<1x18x32xf32>
    %53 = vector.shape_cast %52 : vector<1x18x32xf32> to vector<18x32xf32>
    %54 = arith.mulf %51, %53 : vector<18x32xf32>
    %c2_22 = arith.constant 2 : index
    %c0_23 = arith.constant 0 : index
    %c0_24 = arith.constant 0 : index
    %55 = vector.load %arg3[%c2_22, %c0_23, %c0_24] : memref<3x18x32xf32, #tpu.memory_space<vmem>>, vector<1x18x32xf32>
    %56 = vector.shape_cast %55 : vector<1x18x32xf32> to vector<18x32xf32>
    %57 = arith.addf %54, %56 : vector<18x32xf32>
    %58 = vector.extract_strided_slice %57 {offsets = [0, 0], sizes = [16, 32], strides = [1, 1]} : vector<18x32xf32> to vector<16x32xf32>
    %59 = vector.shape_cast %58 : vector<16x32xf32> to vector<2x8x32xf32>
    %60 = vector.extract_strided_slice %57 {offsets = [16, 0], sizes = [2, 32], strides = [1, 1]} : vector<18x32xf32> to vector<2x32xf32>
    %61 = vector.shape_cast %60 : vector<2x32xf32> to vector<2x1x32xf32>
    %62 = vector.broadcast %61 : vector<2x1x32xf32> to vector<2x8x32xf32>
    %63 = arith.mulf %59, %62 : vector<2x8x32xf32>
    %cst_25 = arith.constant dense<0.000000e+00> : vector<2x8xf32>
    %64 = vector.multi_reduction <add>, %63, %cst_25 [2] : vector<2x8x32xf32> to vector<2x8xf32>
    %65 = vector.broadcast %2 : f32 to vector<2x8xf32>
    %66 = arith.mulf %64, %65 : vector<2x8xf32>
    %cst_26 = arith.constant dense<0xFF800000> : vector<2xf32>
    %67 = vector.multi_reduction <maximumf>, %66, %cst_26 [1] : vector<2x8xf32> to vector<2xf32>
    %68 = vector.shape_cast %67 : vector<2xf32> to vector<2x1xf32>
    %69 = vector.broadcast %68 : vector<2x1xf32> to vector<2x8xf32>
    %70 = arith.subf %66, %69 : vector<2x8xf32>
    %71 = math.exp %70 : vector<2x8xf32>
    %cst_27 = arith.constant dense<0.000000e+00> : vector<2xf32>
    %72 = vector.multi_reduction <add>, %71, %cst_27 [1] : vector<2x8xf32> to vector<2xf32>
    %73 = vector.shape_cast %72 : vector<2xf32> to vector<2x1xf32>
    %74 = tpu.reciprocal %73 : vector<2x1xf32> -> vector<2x1xf32>
    %75 = vector.broadcast %74 : vector<2x1xf32> to vector<2x8xf32>
    %76 = arith.mulf %71, %75 : vector<2x8xf32>
    %77 = arith.mulf %76, %1 : vector<2x8xf32>
    %cst_28 = arith.constant dense<0.000000e+00> : vector<2xf32>
    %78 = vector.multi_reduction <add>, %77, %cst_28 [1] : vector<2x8xf32> to vector<2xf32>
    %79 = vector.shape_cast %78 : vector<2xf32> to vector<2x1xf32>
    %cst_29 = arith.constant 9.99999974E-5 : f32
    %cst_30 = arith.constant 0.999899983 : f32
    %80 = vector.broadcast %cst_29 : f32 to vector<2x1xf32>
    %81 = arith.maximumf %80, %79 : vector<2x1xf32>
    %82 = vector.broadcast %cst_30 : f32 to vector<2x1xf32>
    %83 = arith.minimumf %82, %81 : vector<2x1xf32>
    %cst_31 = arith.constant 1.000000e+00 : f32
    %84 = vector.broadcast %cst_31 : f32 to vector<2x1xf32>
    %85 = arith.subf %84, %83 : vector<2x1xf32>
    %86 = arith.divf %83, %85 : vector<2x1xf32>
    %87 = math.log %86 : vector<2x1xf32>
    %88 = vector.broadcast %3 : f32 to vector<2x1xf32>
    %89 = arith.mulf %88, %87 : vector<2x1xf32>
    %90 = vector.broadcast %4 : f32 to vector<2x1xf32>
    %91 = arith.addf %89, %90 : vector<2x1xf32>
    %92 = arith.negf %91 : vector<2x1xf32>
    %93 = math.exp %92 : vector<2x1xf32>
    %cst_32 = arith.constant 1.000000e+00 : f32
    %94 = vector.broadcast %cst_32 : f32 to vector<2x1xf32>
    %95 = arith.addf %94, %93 : vector<2x1xf32>
    %96 = arith.divf %94, %95 : vector<2x1xf32>
    %c0_33 = arith.constant 0 : index
    %c0_34 = arith.constant 0 : index
    %97 = vector.load %arg5[%c0_33, %c0_34] : memref<2x1xf32, #tpu.memory_space<vmem>>, vector<2x1xf32>
    tpu.vector_store %arg5[%c0_33, %c0_34], %96 {strides = array<i32>} : memref<2x1xf32, #tpu.memory_space<vmem>>, vector<2x1xf32>,
    return
  }
}

</mosaic_0001>

<bundles_post_ra>
// kernel: tpu_custom_call.1
= control target key start
LH: loop header
LB: loop body
LE: loop exit
PB: predicated region body
PF: predicated region fallthrough
CT: control target
= control target key end

     0   :  { %10 = vsyncpa [#allocation3], 0  ;;  %s781_s0 = inlined_call_operand.hbm [shape: f32[18,32], index: 0, kind: input, shape index: {}]   ;;  %s782_s1 = inlined_call_operand.hbm [shape: f32[2,8], index: 1, kind: input, shape index: {}]   ;;  %s783_s2 = inlined_call_operand.hbm [shape: f32[32,64], index: 2, kind: input, shape index: {}]   ;;  %s784_s3 = inlined_call_operand.hbm [shape: f32[3,18,32], index: 3, kind: input, shape index: {}]   ;;  %s785_s4 = inlined_call_operand.vmem [shape: f32[3], index: 4, kind: input, shape index: {}]   ;;  %s786_s5 = inlined_call_operand.vmem [shape: f32[2,1], index: 5, kind: output, shape index: {}]  }
   0x1   :  { %11 = vsyncpa [#allocation6], 0 }
   0x2   :  { %12 = vsyncpa [#allocation9], 0  ;;  %s32_s20 = sshll.u32 %s782_s1, 4  ;;  %s33_s20 = int_to_ptr.hbm [resolvable:$true] %s32_s20 }
   0x3   :  { %13 = vsyncpa [#allocation4], 0  ;;  %s663_s21 = smov [#allocation5]   ;;  %s18_s25 = sshll.u32 %s781_s0, 4  ;;  %s19_s25 = int_to_ptr.hbm [resolvable:$true] %s18_s25 }
   0x4   :  { %s34_s22 = sshll.u32 %s663_s21, 4  ;;  %s664_s26 = smov [#allocation2]   ;;  %s35_s22 = int_to_ptr.vmem [resolvable:$true] %s34_s22 }
   0x5   :  { %37 = dma.hbm_to_vmem [thread:$0]  %s33_s20, 32, %s35_s22, [#allocation6]  }
   0x6   :  { %s20_s27 = sshll.u32 %s664_s26, 4  ;;  %s665_s28 = smov 128   ;;  %s21_s27 = int_to_ptr.vmem [resolvable:$true] %s20_s27 }
   0x7   :  { %s666_s29 = smov 8   ;;  %s42_s1 = sshll.u32 %s783_s2, 4  ;;  %s43_s1 = int_to_ptr.hbm [resolvable:$true] %s42_s1 }
   0x8   :  { %26 = dma.hbm_to_vmem [thread:$0]  %s19_s25, 384, %s21_s27, [#allocation3], %s665_s28, %s665_s28, %s666_s29  }
   0x9   :  { %s667_s7 = smov [#allocation7]   ;;  %s55_s0 = sshll.u32 %s784_s3, 4  ;;  %s56_s0 = int_to_ptr.hbm [resolvable:$true] %s55_s0 }
   0xa   :  { %s44_s8 = sshll.u32 %s667_s7, 4  ;;  %s668_s11 = smov [#allocation8]   ;;  %s45_s8 = int_to_ptr.vmem [resolvable:$true] %s44_s8 }
   0xb   :  { %50 = dma.hbm_to_vmem [thread:$0]  %s43_s1, 512, %s45_s8, [#allocation6], %s665_s28, %s665_s28, %s666_s29  }
   0xc   :  { %s57_s12 = sshll.u32 %s668_s11, 4  ;;  %s69_s15 = sshll.u32 %s785_s4, 4  ;;  %s58_s12 = int_to_ptr.vmem [resolvable:$true] %s57_s12  ;;  %s70_s15 = int_to_ptr.vmem [resolvable:$true] %s69_s15 }
   0xd   :  { %63 = dma.hbm_to_vmem [thread:$0]  %s56_s0, 1152, %s58_s12, [#allocation9], %s665_s28, %s665_s28, %s666_s29  }
   0xe   :  { %s669_s2 = smov [#allocation10]  }
   0xf   :  { %72 = dma.vmem_to_smem %s70_s15, 16, %s669_s2, [#allocation4]  }
  0x10   :  { %655 = dma.done.wait [#allocation3], 384  }
  0x11   :  { %656 = vsyncadd [#allocation3], 4294966912 }
  0x12   :  { %657 = dma.done.wait [#allocation6], 544  }
  0x13   :  { %658 = vsyncadd [#allocation6], 4294966752 }
  0x14   :  { %659 = dma.done.wait [#allocation9], 1152  }
  0x15   :  { %660 = vsyncadd [#allocation9], 4294966144 }
  0x16   :  { %661 = dma.done.wait [#allocation4], 16  }
  0x17   :  { %662 = vsyncadd [#allocation4], 4294967280 }
  0x18   :  { %93 = sfence }
  0x19   :  { %v717_v0 = vld [vmem:[#allocation2 + $0x10] sm:$0x3]  ;;  %vm108_vm0 = vcmask 254976   ;;  %v719_v1 = vld [vmem:[#allocation2] sm:$0xff]  ;;  %vm101_vm1 = vcmask 261120   ;;  %v727_v5 = vld [vmem:[#allocation2 + $0x8] sm:$0xff] }
  0x1a   :  { %v109_v2 = vsel %vm108_vm0, %v717_v0, 0.0  ;;  %v102_v3 = vsel %vm101_vm1, %v719_v1, 0.0  ;;  %v112_v4 = vmul.f32 %v719_v1, %v719_v1  ;;  %v114_v7 = vmul.f32 %v717_v0, %v717_v0  ;;  %v178_v12 = vld [vmem:[#allocation7 + $0x18] sm:$0xff]  ;;  %v177_v13 = vld [vmem:[#allocation7 + $0x10] sm:$0xff]  ;;  %v176_v14 = vld [vmem:[#allocation7 + $0x8] sm:$0xff]  ;;  %s670_s3 = smov 96  }
  0x1b   :  { %110 = vadd.xlane.f32.xlu0 %v109_v2  ;;  %103 = vadd.xlane.f32.xlu1 %v102_v3  ;;  %v113_v8 = vmul.f32 %v727_v5, %v727_v5  ;;  %v105_v10 = vsel %vm101_vm1, %v727_v5, 0.0  ;;  %v175_v15 = vld [vmem:[#allocation7] sm:$0xff]  ;;  %s98_s4 = sld [smem:[#allocation10]] }
  0x1c   :  { %v115_v6 = vsel %vm101_vm1, %v112_v4, 0.0  ;;  %v121_v9 = vsel %vm108_vm0, %v114_v7, 0.0  ;;  %200 = vmatpush.msra.mxu0 %v178_v12  ;;  %499 = vmatpush.msra.mxu2 %v178_v12  ;;  %s492_s16 = sld [smem:[#allocation10 + $0x1]] }
  0x1d   :  { %116 = vadd.xlane.f32.xlu2 %v115_v6  ;;  %v118_v11 = vsel %vm101_vm1, %v113_v8, 0.0  ;;  %498 = vmatpush.msra.mxu1 %v178_v12  ;;  %s493_s17 = sld [smem:[#allocation10 + $0x2]] }
  0x1e   :  { %201 = vmatpush.msra.mxu0 %v177_v13  ;;  %501 = vmatpush.msra.mxu2 %v177_v13 }
  0x1f   :  { %500 = vmatpush.msra.mxu1 %v177_v13 }
  0x20   :  { %202 = vmatpush.msra.mxu0 %v176_v14  ;;  %503 = vmatpush.msra.mxu2 %v176_v14 }
  0x21   :  { %502 = vmatpush.msra.mxu1 %v176_v14 }
  0x22   :  { %203 = vmatpush.msra.mxu0 %v175_v15  ;;  %505 = vmatpush.msra.mxu2 %v175_v15 }
  0x23   :  { %122 = vadd.xlane.f32.xlu0 %v121_v9  ;;  %106 = vadd.xlane.f32.xlu1 %v105_v10  ;;  %v238_v9 = vld [vmem:[#allocation8 + $0x10] sm:$0x3] }
  0x24   :  { %504 = vmatpush.msra.mxu1 %v175_v15 }
  0x25   :  { %119 = vadd.xlane.f32.xlu2 %v118_v11 }
  0x8e   :  { %v111_v16 = vpop.xlane.xlu0 %110  ;;  %v104_v17 = vpop.xlane.xlu1 %103 }
  0x8f   :  { %v124_v18 = vmul.f32 0.03125, %v104_v17  ;;  %v126_v22 = vmul.f32 0.03125, %v111_v16 }
  0x90   :  { %v117_v19 = vpop.xlane.xlu2 %116 }
  0x91   :  { %v130_v20 = vmul.f32 %v124_v18, %v124_v18  ;;  %v127_v21 = vmul.f32 0.03125, %v117_v19  ;;  %v132_v27 = vmul.f32 %v126_v22, %v126_v22  ;;  %v136_v45 = vsub.f32 %v719_v1, %v124_v18  ;;  %v236_v1 = vld [vmem:[#allocation8] sm:$0xff] }
  0x92   :  { %v138_v57 = vsub.f32 %v717_v0, %v126_v22  ;;  %v237_v0 = vld [vmem:[#allocation8 + $0x8] sm:$0xff] }
  0x93   :  { %v133_v23 = vsub.f32 %v127_v21, %v130_v20 }
  0x95   :  { %v139_v24 = vadd.f32 1e-05, %v133_v23 }
  0x96   :  { %v123_v25 = vpop.xlane.xlu0 %122  ;;  %v107_v26 = vpop.xlane.xlu1 %106 }
  0x97   :  { %v129_v28 = vmul.f32 0.03125, %v123_v25  ;;  %v125_v29 = vmul.f32 0.03125, %v107_v26  ;;  %521 = vrsqrt.f32 %v139_v24  ;;  %vm148_vm2 = vweird.f32 %v139_v24 }
  0x98   :  { %v120_v30 = vpop.xlane.xlu2 %119 }
  0x99   :  { %v135_v31 = vsub.f32 %v129_v28, %v132_v27  ;;  %v131_v32 = vmul.f32 %v125_v29, %v125_v29  ;;  %v128_v33 = vmul.f32 0.03125, %v120_v30  ;;  %v137_v58 = vsub.f32 %v727_v5, %v125_v29 }
  0x9b   :  { %v141_v34 = vadd.f32 1e-05, %v135_v31  ;;  %v134_v35 = vsub.f32 %v128_v33, %v131_v32 }
  0x9d   :  { %523 = vrsqrt.f32 %v141_v34  ;;  %v140_v36 = vadd.f32 1e-05, %v134_v35  ;;  %v522_v37 = vpop.eup %521  ;;  %vm168_vm8 = vweird.f32 %v141_v34 }
  0x9e   :  { %v143_v38 = vmul.f32 %v522_v37, %v139_v24  ;;  %vm149_vm3 = vweird.f32 %v522_v37 }
  0x9f   :  { %525 = vrsqrt.f32 %v140_v36  ;;  %vm150_vm4 = vmor %vm148_vm2, %vm149_vm3  ;;  %vm158_vm5 = vweird.f32 %v140_v36 }
  0xa0   :  { %v144_v39 = vmul.f32 %v522_v37, %v143_v38 }
  0xa2   :  { %v145_v41 = vmul.f32 0.5, %v144_v39 }
  0xa3   :  { %v524_v40 = vpop.eup %523 }
  0xa4   :  { %v163_v42 = vmul.f32 %v524_v40, %v141_v34  ;;  %v146_v44 = vsub.f32 1.5, %v145_v41  ;;  %vm169_vm6 = vweird.f32 %v524_v40 }
  0xa5   :  { %v526_v43 = vpop.eup %525  ;;  %vm170_vm9 = vmor %vm168_vm8, %vm169_vm6  ;;  %vm354_vm6 = vcmask 58368  }
  0xa6   :  { %v164_v46 = vmul.f32 %v524_v40, %v163_v42  ;;  %v153_v47 = vmul.f32 %v526_v43, %v140_v36  ;;  %v147_v48 = vmul.f32 %v522_v37, %v146_v44  ;;  %vm159_vm7 = vweird.f32 %v526_v43 }
  0xa7   :  { %vm160_vm10 = vmor %vm158_vm5, %vm159_vm7  ;;  %vm351_vm5 = vcmask 1041409  }
  0xa8   :  { %v165_v49 = vmul.f32 0.5, %v164_v46  ;;  %v154_v50 = vmul.f32 %v526_v43, %v153_v47  ;;  %v151_v51 = vsel %vm150_vm4, %v522_v37, %v147_v48 }
  0xa9   :  { %v172_v54 = vmul.f32 %v151_v51, %v136_v45 }
  0xaa   :  { %v166_v52 = vsub.f32 1.5, %v165_v49  ;;  %v155_v53 = vmul.f32 0.5, %v154_v50 }
  0xab   :  { %494 = vmatmul.msk.f32.vlgmr.msra.gmra.mxu0 %vm101_vm1, %v172_v54 }
  0xac   :  { %v156_v55 = vsub.f32 1.5, %v155_v53  ;;  %v167_v56 = vmul.f32 %v524_v40, %v166_v52 }
  0xae   :  { %v171_v59 = vsel %vm170_vm9, %v524_v40, %v167_v56  ;;  %v157_v60 = vmul.f32 %v526_v43, %v156_v55  ;;  %v317_v55 = vld [vmem:[#allocation8 + $0x28] sm:$0x3] }
  0xaf   :  { %v174_v61 = vmul.f32 %v171_v59, %v138_v57  ;;  %v324_v59 = vld [vmem:[#allocation8 + $0x40] sm:$0x3] }
  0xb0   :  { %v161_v62 = vsel %vm160_vm10, %v526_v43, %v157_v60 }
  0xb1   :  { %496 = vmatmul.msk.f32.vlgmr.msra.gmra.mxu2 %vm101_vm1, %v174_v61  ;;  %v173_v63 = vmul.f32 %v161_v62, %v137_v58 }
  0xb3   :  { %495 = vmatmul.msk.f32.vlgmr.msra.gmra.mxu1 %vm101_vm1, %v173_v63 }
 0x128   :  { %v205_v2 = vpop.f32.mrf.mxu0 }
 0x129   :  { %v744_v3 = vadd.f32 %v236_v1, %v205_v2 }
 0x12b   :  { %v242_v4 = vsel %vm101_vm1, %v744_v3, 0.0  ;;  %v251_v15 = vmul.f32 %v744_v3, %v744_v3 }
 0x12c   :  { %243 = vadd.xlane.f32.xlu1 %v242_v4 }
 0x12d   :  { %v254_v17 = vsel %vm101_vm1, %v251_v15, 0.0 }
 0x130   :  { %v208_v5 = vpop.f32.mrf.mxu1 }
 0x131   :  { %v748_v6 = vadd.f32 %v237_v0, %v208_v5  ;;  %v315_v0 = vld [vmem:[#allocation8 + $0x18] sm:$0xff] }
 0x133   :  { %v245_v7 = vsel %vm101_vm1, %v748_v6, 0.0  ;;  %v252_v16 = vmul.f32 %v748_v6, %v748_v6 }
 0x134   :  { %v211_v8 = vpop.f32.mrf.mxu2  ;;  %246 = vadd.xlane.f32.xlu2 %v245_v7 }
 0x135   :  { %228 = vrot.lane.b32.xlu0 %v211_v8, %s670_s3  ;;  %v257_v18 = vsel %vm101_vm1, %v252_v16, 0.0  ;;  %v322_v8 = vld [vmem:[#allocation8 + $0x30] sm:$0xff] }
 0x19f   :  { %v244_v19 = vpop.xlane.xlu1 %243 }
 0x1a0   :  { %v263_v27 = vmul.f32 0.03125, %v244_v19 }
 0x1a2   :  { %v269_v30 = vmul.f32 %v263_v27, %v263_v27  ;;  %v275_v63 = vsub.f32 %v744_v3, %v263_v27 }
 0x1a7   :  { %v229_v10 = vpop.permute.xlu0 %228  ;;  %v247_v20 = vpop.xlane.xlu2 %246 }
 0x1a8   :  { %v241_v11 = vadd.f32 %v238_v9, %v229_v10  ;;  %v264_v31 = vmul.f32 0.03125, %v247_v20  ;;  %v316_v10 = vld [vmem:[#allocation8 + $0x20] sm:$0xff] }
 0x1aa   :  { %v248_v12 = vsel %vm108_vm0, %v241_v11, 0.0  ;;  %v253_v13 = vmul.f32 %v241_v11, %v241_v11  ;;  %v270_v34 = vmul.f32 %v264_v31, %v264_v31  ;;  %v276_v5 = vsub.f32 %v748_v6, %v264_v31 }
 0x1ab   :  { %249 = vadd.xlane.f32.xlu1 %v248_v12 }
 0x1ac   :  { %v260_v14 = vsel %vm108_vm0, %v253_v13, 0.0 }
 0x1ad   :  { %261 = vadd.xlane.f32.xlu2 %v260_v14  ;;  %v323_v14 = vld [vmem:[#allocation8 + $0x38] sm:$0xff] }
 0x1b3   :  { %255 = vadd.xlane.f32.xlu1 %v254_v17 }
 0x1b5   :  { %258 = vadd.xlane.f32.xlu2 %v257_v18 }
 0x21e   :  { %v250_v21 = vpop.xlane.xlu1 %249 }
 0x21f   :  { %v265_v22 = vmul.f32 0.03125, %v250_v21 }
 0x220   :  { %v262_v23 = vpop.xlane.xlu2 %261 }
 0x221   :  { %v271_v24 = vmul.f32 %v265_v22, %v265_v22  ;;  %v268_v25 = vmul.f32 0.03125, %v262_v23  ;;  %v277_v51 = vsub.f32 %v241_v11, %v265_v22  ;;  %v347_v22 = vlaneseq }
 0x222   :  { %v342_v23 = vstv %s98_s4 }
 0x223   :  { %v274_v26 = vsub.f32 %v268_v25, %v271_v24  ;;  %v764_v25 = vand.u32 127, %v347_v22 }
 0x225   :  { %v280_v28 = vadd.f32 1e-05, %v274_v26 }
 0x226   :  { %v256_v29 = vpop.xlane.xlu1 %255 }
 0x227   :  { %527 = vrsqrt.f32 %v280_v28  ;;  %v266_v32 = vmul.f32 0.03125, %v256_v29  ;;  %vm307_vm12 = vweird.f32 %v280_v28 }
 0x228   :  { %v259_v33 = vpop.xlane.xlu2 %258 }
 0x229   :  { %v272_v35 = vsub.f32 %v266_v32, %v269_v30  ;;  %v267_v36 = vmul.f32 0.03125, %v259_v33  ;;  %v671_v33 = vmov 0  }
 0x22a   :  { %516 = vset.pattern.permute.xlu2 %v671_v33  ;;  %515 = vset.pattern.permute.xlu1 %v671_v33 }
 0x22b   :  { %v278_v37 = vadd.f32 1e-05, %v272_v35  ;;  %v273_v38 = vsub.f32 %v267_v36, %v270_v34 }
 0x22d   :  { %v528_v39 = vpop.eup %527  ;;  %529 = vrsqrt.f32 %v278_v37  ;;  %v279_v40 = vadd.f32 1e-05, %v273_v38  ;;  %vm287_vm15 = vweird.f32 %v278_v37 }
 0x22e   :  { %v302_v41 = vmul.f32 %v528_v39, %v280_v28  ;;  %vm308_vm11 = vweird.f32 %v528_v39 }
 0x22f   :  { %531 = vrsqrt.f32 %v279_v40  ;;  %vm309_vm13 = vmor %vm307_vm12, %vm308_vm11  ;;  %vm297_vm3 = vweird.f32 %v279_v40 }
 0x230   :  { %v303_v42 = vmul.f32 %v528_v39, %v302_v41 }
 0x232   :  { %v304_v43 = vmul.f32 0.5, %v303_v42 }
 0x233   :  { %v530_v44 = vpop.eup %529 }
 0x234   :  { %v305_v45 = vsub.f32 1.5, %v304_v43  ;;  %v282_v46 = vmul.f32 %v530_v44, %v278_v37  ;;  %vm288_vm14 = vweird.f32 %v530_v44  ;;  %v408_v43 = vshrl.u32 %v347_v22, 7 }
 0x235   :  { %v532_v47 = vpop.eup %531  ;;  %vm289_vm2 = vmor %vm287_vm15, %vm288_vm14 }
 0x236   :  { %v306_v48 = vmul.f32 %v528_v39, %v305_v45  ;;  %v283_v49 = vmul.f32 %v530_v44, %v282_v46  ;;  %v292_v50 = vmul.f32 %v532_v47, %v279_v40  ;;  %vm298_vm0 = vweird.f32 %v532_v47  ;;  %518 = vset.pattern.permute.xlu0 %v408_v43 }
 0x237   :  { %vm299_vm4 = vmor %vm297_vm3, %vm298_vm0  ;;  %vm482_vm0 = vcmask 1024  }
 0x238   :  { %v310_v52 = vsel %vm309_vm13, %v528_v39, %v306_v48  ;;  %v284_v53 = vmul.f32 0.5, %v283_v49  ;;  %v293_v54 = vmul.f32 %v532_v47, %v292_v50 }
 0x239   :  { %v313_v56 = vmul.f32 %v310_v52, %v277_v51 }
 0x23a   :  { %v285_v57 = vsub.f32 1.5, %v284_v53  ;;  %v294_v58 = vmul.f32 0.5, %v293_v54 }
 0x23b   :  { %v320_v60 = vmul.f32 %v317_v55, %v313_v56 }
 0x23c   :  { %v286_v61 = vmul.f32 %v530_v44, %v285_v57  ;;  %v295_v62 = vsub.f32 1.5, %v294_v58 }
 0x23d   :  { %v327_v1 = vadd.f32 %v324_v59, %v320_v60 }
 0x23e   :  { %v296_v2 = vmul.f32 %v532_v47, %v295_v62  ;;  %v290_v4 = vsel %vm289_vm2, %v530_v44, %v286_v61  ;;  %v97_v44 = vld [vmem:[#allocation5] sm:$0x3] }
 0x23f   :  { %v311_v7 = vmul.f32 %v290_v4, %v275_v63  ;;  %v329_v13 = vrot.slane %v327_v1, 1  ;;  %v330_v16 = vperm.slane %v327_v1, 0  ;;  %v413_v45 = vperm.slane %v97_v44, 1 }
 0x240   :  { %v300_v9 = vsel %vm299_vm4, %v532_v47, %v296_v2  ;;  %v406_v46 = vperm.slane %v97_v44, 0 }
 0x241   :  { %v318_v11 = vmul.f32 %v315_v0, %v311_v7  ;;  %v312_v12 = vmul.f32 %v300_v9, %v276_v5  ;;  %v331_v19 = vperm.slane %v329_v13, 0 }
 0x243   :  { %v325_v15 = vadd.f32 %v322_v8, %v318_v11  ;;  %v319_v3 = vmul.f32 %v316_v10, %v312_v12 }
 0x245   :  { %v334_v17 = vmul.f32 %v330_v16, %v325_v15  ;;  %v326_v18 = vadd.f32 %v323_v14, %v319_v3 }
 0x247   :  { %v336_v20 = vsel %vm101_vm1, %v334_v17, 0.0  ;;  %v335_v21 = vmul.f32 %v331_v19, %v326_v18 }
 0x248   :  { %337 = vadd.xlane.f32.xlu0 %v336_v20 }
 0x249   :  { %v339_v6 = vsel %vm101_vm1, %v335_v21, 0.0 }
 0x24a   :  { %340 = vadd.xlane.f32.xlu1 %v339_v6 }
 0x25c   :  { %418 = vperm.xlu0 %518, %v413_v45  }
 0x264   :  { %520 = vset.pattern.permute.xlu0 %v671_v33 }
 0x2bb   :  { %v338_v24 = vpop.xlane.xlu0 %337 }
 0x2bc   :  { %v343_v26 = vmul.f32 %v342_v23, %v338_v24 }
 0x2bd   :  { %v341_v27 = vpop.xlane.xlu1 %340 }
 0x2be   :  { %v344_v28 = vmul.f32 %v342_v23, %v341_v27  ;;  %v349_v29 = vperm.slane %v343_v26, %v764_v25 }
 0x2c0   :  { %v350_v30 = vperm.slane %v344_v28, %v764_v25 }
 0x2c2   :  { %v352_v31 = vsel %vm351_vm5, %v350_v30, %v349_v29  ;;  %v459_v30 = vstv %s492_s16 }
 0x2c3   :  { %v355_v32 = vsel %vm354_vm6, %v352_v31, -inf }
 0x2c4   :  { %356 = vmax.xlane.f32.xlu2 %v355_v32  ;;  %v461_v32 = vstv %s493_s17 }
 0x2ce   :  { %v419_v8 = vpop.permute.xlu0 %418 }
 0x337   :  { %v357_v34 = vpop.xlane.xlu2 %356 }
 0x338   :  { %v359_v35 = vperm.slane %v357_v34, 0  ;;  %v360_v36 = vperm.slane %v357_v34, 1 }
 0x33a   :  { %v363_v37 = vsub.f32 %v343_v26, %v359_v35  ;;  %v364_v38 = vsub.f32 %v344_v28, %v360_v36 }
 0x33c   :  { %v365_v39 = vmul.f32 1.442695, %v363_v37  ;;  %v367_v40 = vmul.f32 1.442695, %v364_v38 }
 0x33e   :  { %533 = vpow2.f32 %v365_v39 }
 0x33f   :  { %535 = vpow2.f32 %v367_v40 }
 0x344   :  { %v534_v41 = vpop.eup %533 }
 0x345   :  { %v536_v42 = vpop.eup %535  ;;  %372 = vperm.xlu1 %515, %v534_v41  }
 0x346   :  { %375 = vperm.xlu2 %516, %v536_v42  }
 0x34d   :  { %517 = vset.pattern.permute.xlu1 %v408_v43 }
 0x355   :  { %411 = vperm.xlu1 %517, %v406_v46  }
 0x35d   :  { %519 = vset.pattern.permute.xlu1 %v671_v33 }
 0x3a0   :  { %v376_v47 = vpop.permute.xlu2 %375 }
 0x3a1   :  { %v378_v49 = vperm.slane %v376_v47, %v764_v25 }
 0x3b7   :  { %v373_v48 = vpop.permute.xlu1 %372 }
 0x3b8   :  { %v377_v50 = vperm.slane %v373_v48, %v764_v25 }
 0x3ba   :  { %v379_v51 = vsel %vm351_vm5, %v378_v49, %v377_v50 }
 0x3bb   :  { %v381_v52 = vsel %vm354_vm6, %v379_v51, 0.0 }
 0x3bc   :  { %382 = vadd.xlane.f32.xlu2 %v381_v52 }
 0x3c7   :  { %v412_v2 = vpop.permute.xlu1 %411 }
 0x42f   :  { %v383_v53 = vpop.xlane.xlu2 %382 }
 0x430   :  { %537 = vrcp.f32 %v383_v53  ;;  %v395_v57 = vand.u32 2147483648, %v383_v53  ;;  %v393_v59 = vand.u32 2147483647, %v383_v53  ;;  %vm389_vm7 = vweird.f32 %v383_v53 }
 0x432   :  { %v396_v61 = vor.u32 1.1754944e-38, %v395_v57  ;;  %vm394_vm9 = vcmp.eq.f32.partialorder %v393_v59, 8.507059e+37 }
 0x436   :  { %v538_v54 = vpop.eup %537 }
 0x437   :  { %v385_v55 = vmul.f32 %v538_v54, %v383_v53  ;;  %vm390_vm1 = vweird.f32 %v538_v54 }
 0x438   :  { %vm391_vm8 = vmor %vm389_vm7, %vm390_vm1 }
 0x439   :  { %v386_v56 = vsub.f32 1.0, %v385_v55 }
 0x43b   :  { %v387_v58 = vmul.f32 %v538_v54, %v386_v56 }
 0x43d   :  { %v388_v60 = vadd.f32 %v538_v54, %v387_v58 }
 0x43f   :  { %v392_v62 = vsel %vm391_vm8, %v538_v54, %v388_v60 }
 0x440   :  { %v397_v63 = vsel %vm394_vm9, %v396_v61, %v392_v62 }
 0x441   :  { %v399_v1 = vperm.slane %v397_v63, 0  ;;  %v400_v0 = vperm.slane %v397_v63, 1 }
 0x443   :  { %v403_v4 = vmul.f32 %v534_v41, %v399_v1  ;;  %v404_v7 = vmul.f32 %v536_v42, %v400_v0 }
 0x445   :  { %v422_v5 = vmul.f32 %v412_v2, %v403_v4  ;;  %v423_v9 = vmul.f32 %v419_v8, %v404_v7 }
 0x447   :  { %427 = vperm.xlu1 %519, %v422_v5  }
 0x44f   :  { %430 = vperm.xlu1 %519, %v423_v9  }
 0x4b9   :  { %v428_v10 = vpop.permute.xlu1 %427 }
 0x4ba   :  { %v432_v12 = vperm.slane %v428_v10, %v764_v25 }
 0x4c1   :  { %v431_v11 = vpop.permute.xlu1 %430 }
 0x4c2   :  { %v433_v13 = vperm.slane %v431_v11, %v764_v25 }
 0x4c4   :  { %v434_v14 = vsel %vm351_vm5, %v433_v13, %v432_v12 }
 0x4c5   :  { %v436_v15 = vsel %vm354_vm6, %v434_v14, 0.0 }
 0x4c6   :  { %437 = vadd.xlane.f32.xlu1 %v436_v15 }
 0x539   :  { %v438_v16 = vpop.xlane.xlu1 %437 }
 0x53a   :  { %v439_v3 = vmax.f32 %v438_v16, 0.0001 }
 0x53c   :  { %v440_v17 = vmin.f32 %v439_v3, 0.9999 }
 0x53e   :  { %v441_v18 = vsub.f32 1.0, %v440_v17 }
 0x540   :  { %539 = vrcp.f32 %v441_v18  ;;  %v453_v6 = vand.u32 2147483648, %v441_v18  ;;  %v451_v23 = vand.u32 2147483647, %v441_v18  ;;  %vm447_vm11 = vweird.f32 %v441_v18 }
 0x542   :  { %v454_v25 = vor.u32 1.1754944e-38, %v453_v6  ;;  %vm452_vm13 = vcmp.eq.f32.partialorder %v451_v23, 8.507059e+37 }
 0x546   :  { %v540_v19 = vpop.eup %539 }
 0x547   :  { %v443_v20 = vmul.f32 %v540_v19, %v441_v18  ;;  %vm448_vm10 = vweird.f32 %v540_v19 }
 0x548   :  { %vm449_vm12 = vmor %vm447_vm11, %vm448_vm10 }
 0x549   :  { %v444_v21 = vsub.f32 1.0, %v443_v20 }
 0x54b   :  { %v445_v22 = vmul.f32 %v540_v19, %v444_v21 }
 0x54d   :  { %v446_v24 = vadd.f32 %v540_v19, %v445_v22 }
 0x54f   :  { %v450_v26 = vsel %vm449_vm12, %v540_v19, %v446_v24 }
 0x550   :  { %v455_v27 = vsel %vm452_vm13, %v454_v25, %v450_v26 }
 0x551   :  { %v456_v28 = vmul.f32 %v455_v27, %v440_v17 }
 0x553   :  { %541 = vlog2.f32 %v456_v28 }
 0x559   :  { %v542_v29 = vpop.eup %541 }
 0x55a   :  { %v458_v31 = vmul.f32 0.6931472, %v542_v29 }
 0x55c   :  { %v460_v33 = vmul.f32 %v459_v30, %v458_v31 }
 0x55e   :  { %v462_v34 = vadd.f32 %v461_v32, %v460_v33 }
 0x560   :  { %v497_v35 = vmul.f32 -1.442695, %v462_v34 }
 0x562   :  { %543 = vpow2.f32 %v497_v35 }
 0x568   :  { %v544_v36 = vpop.eup %543 }
 0x569   :  { %v466_v37 = vadd.f32 1.0, %v544_v36 }
 0x56b   :  { %545 = vrcp.f32 %v466_v37  ;;  %v478_v41 = vand.u32 2147483648, %v466_v37  ;;  %v476_v43 = vand.u32 2147483647, %v466_v37  ;;  %vm472_vm15 = vweird.f32 %v466_v37 }
 0x56d   :  { %v479_v45 = vor.u32 1.1754944e-38, %v478_v41  ;;  %vm477_vm3 = vcmp.eq.f32.partialorder %v476_v43, 8.507059e+37 }
 0x571   :  { %v546_v38 = vpop.eup %545 }
 0x572   :  { %v468_v39 = vmul.f32 %v546_v38, %v466_v37  ;;  %vm473_vm14 = vweird.f32 %v546_v38 }
 0x573   :  { %vm474_vm2 = vmor %vm472_vm15, %vm473_vm14 }
 0x574   :  { %v469_v40 = vsub.f32 1.0, %v468_v39 }
 0x576   :  { %v470_v42 = vmul.f32 %v546_v38, %v469_v40 }
 0x578   :  { %v471_v44 = vadd.f32 %v546_v38, %v470_v42 }
 0x57a   :  { %v475_v46 = vsel %vm474_vm2, %v546_v38, %v471_v44 }
 0x57b   :  { %v480_v47 = vsel %vm477_vm3, %v479_v45, %v475_v46 }
 0x57c   :  { %483 = vst.msk [vmem:[%s786_s5] sm:$0x3] %vm482_vm0, %v480_v47 }
 0x57d   :  { %488 = vsyncpa [#allocation3], 1 }
 0x57e   :  { %489 = vsyncpa [#allocation6], 1 }
 0x57f   :  { %490 = vsyncpa [#allocation9], 1 }
 0x580   :  { %491 = vsyncpa [#allocation4], 1 }

</bundles_post_ra>
